<compile_context>
chip_gen: v7x
topology: tpu7x:2x2x1
jax: 0.10.0
libtpu: 0.0.40
codegen_flags: <defaults>
</compile_context>

<pallas_src>
import functools

import jax
import jax.numpy as jnp
from jax.experimental import pallas as pl
from jax.experimental.pallas import tpu as pltpu

TM_MAX = 256       # row tile for large batches (fills 256-wide MXU on v6e/v7x)
HIDDEN_PAD = 128   # 50  -> 128 (lane width)
CLASSES_PAD = 128  # 10  -> 128 (lane-dense output slab)


def mlp_kernel(x_ref, w1_ref, b1_ref, w2_ref, b2_ref, o_ref):
    # In-kernel cast: x arrives as f32 (single HBM pass), bf16 only for the MXU.
    x_bf16 = x_ref[...].astype(jnp.bfloat16)
    h = jnp.dot(x_bf16, w1_ref[...], preferred_element_type=jnp.float32)
    # Bias + ReLU stay in f32 (v5e VPU has no bf16 path).
    h = jnp.maximum(h + b1_ref[...], 0.0)
    # fc2: cast the activation to bf16 only for the matmul operand.
    out = jnp.dot(h.astype(jnp.bfloat16), w2_ref[...],
                  preferred_element_type=jnp.float32)
    o_ref[...] = (out + b2_ref[...]).astype(o_ref.dtype)


def prep_params(w1, b1, w2, b2):
    """One-time layout prep: zero-pad hidden/classes to 128, cast weights to bf16.

    w1: (in, 50)  -> (in, 128)  bf16
    b1: (1, 50)   -> (1, 128)   f32
    w2: (50, 10)  -> (128, 128) bf16
    b2: (1, 10)   -> (1, 128)   f32
    Zero padding is exact: ReLU(0) = 0 and zero W2 rows/cols contribute 0.
    """
    in_features, hidden = w1.shape
    num_classes = w2.shape[1]
    w1p = jnp.zeros((in_features, HIDDEN_PAD), jnp.float32).at[:, :hidden].set(w1)
    b1p = jnp.zeros((1, HIDDEN_PAD), jnp.float32).at[:, :hidden].set(b1)
    w2p = jnp.zeros((HIDDEN_PAD, CLASSES_PAD), jnp.float32)
    w2p = w2p.at[:hidden, :num_classes].set(w2)
    b2p = jnp.zeros((1, CLASSES_PAD), jnp.float32).at[:, :num_classes].set(b2)
    return (w1p.astype(jnp.bfloat16), b1p,
            w2p.astype(jnp.bfloat16), b2p)


@functools.partial(jax.jit, static_argnames=("num_classes",))
def mlp_forward(x, w1p, b1p, w2p, b2p, *, num_classes):
    """x: (B, in_features) f32.  Padded/bf16 params from prep_params."""
    B, in_features = x.shape

    # Row tile: the whole (sublane-rounded) batch when small -> a single grid
    # step with everything resident in VMEM (<1 MiB); 256 rows for big batches.
    if B <= TM_MAX:
        tm = max(8, ((B + 7) // 8) * 8)   # B=64 -> 64: no padding, no extra HBM pass
    else:
        tm = TM_MAX
    n_tiles = pl.cdiv(B, tm)
    B_pad = n_tiles * tm
    if B_pad != B:
        x = jnp.pad(x, ((0, B_pad - B), (0, 0)))

    flops = (2 * B_pad * in_features * HIDDEN_PAD
             + 2 * B_pad * HIDDEN_PAD * CLASSES_PAD)
    bytes_accessed = (B_pad * in_features * 4      # x read as f32
                      + w1p.size * 2 + w2p.size * 2
                      + b1p.size * 4 + b2p.size * 4
                      + B_pad * CLASSES_PAD * 4)   # f32 output slab
    cost = pl.CostEstimate(flops=flops, transcendentals=0,
                           bytes_accessed=bytes_accessed)

    out_pad = pl.pallas_call(
        mlp_kernel,
        out_shape=jax.ShapeDtypeStruct((B_pad, CLASSES_PAD), jnp.float32),
        grid_spec=pltpu.PrefetchScalarGridSpec(
            num_scalar_prefetch=0,
            grid=(n_tiles,),
            in_specs=[
                pl.BlockSpec((tm, in_features), lambda i: (i, 0)),          # x tile (f32)
                pl.BlockSpec((in_features, HIDDEN_PAD), lambda i: (0, 0)),  # W1 (resident)
                pl.BlockSpec((1, HIDDEN_PAD), lambda i: (0, 0)),            # b1
                pl.BlockSpec((HIDDEN_PAD, CLASSES_PAD), lambda i: (0, 0)),  # W2
                pl.BlockSpec((1, CLASSES_PAD), lambda i: (0, 0)),           # b2
            ],
            out_specs=pl.BlockSpec((tm, CLASSES_PAD), lambda i: (i, 0)),
        ),
        compiler_params=pltpu.CompilerParams(
            dimension_semantics=("parallel",)),
        cost_estimate=cost,
    )(x, w1p, b1p, w2p, b2p)

    # Lane-dense slab -> logical (B, num_classes). Pure layout plumbing.
    return out_pad[:B, :num_classes]


def init_params(key, input_size, hidden, num_classes):
    """Deterministic init mimicking nn.Linear's U(-1/sqrt(in), 1/sqrt(in))."""
    k1, k2, k3, k4 = jax.random.split(key, 4)
    lim1 = 1.0 / jnp.sqrt(jnp.float32(input_size))
    lim2 = 1.0 / jnp.sqrt(jnp.float32(hidden))
    w1 = jax.random.uniform(k1, (input_size, hidden), jnp.float32, -lim1, lim1)
    b1 = jax.random.uniform(k2, (1, hidden), jnp.float32, -lim1, lim1)
    w2 = jax.random.uniform(k3, (hidden, num_classes), jnp.float32, -lim2, lim2)
    b2 = jax.random.uniform(k4, (1, num_classes), jnp.float32, -lim2, lim2)
    return w1, b1, w2, b2


if __name__ == "__main__":
    key = jax.random.PRNGKey(0)
    kx, kp = jax.random.split(key)

    batch = 64                # matches the module spec: torch.randn(64, 1, 28, 28)
    input_size = 28 * 28      # 784
    hidden = 50
    num_classes = 10

    # Simulate the NCHW input then flatten, like the PyTorch pipeline would.
    x_nchw = jax.random.normal(kx, (batch, 1, 28, 28), jnp.float32)
    x = x_nchw.reshape(batch, input_size)

    w1, b1, w2, b2 = init_params(kp, input_size, hidden, num_classes)
    w1p, b1p, w2p, b2p = prep_params(w1, b1, w2, b2)

    out = mlp_forward(x, w1p, b1p, w2p, b2p, num_classes=num_classes)
    out = jax.block_until_ready(out)

    # Pure-JAX reference mirroring the kernel's bf16-operand / f32-accumulate
    # arithmetic (same values the MXU sees after the in-kernel cast).
    x_b = x.astype(jnp.bfloat16).astype(jnp.float32)
    w1_32 = w1p.astype(jnp.float32)
    w2_32 = w2p.astype(jnp.float32)
    h_ref = jnp.maximum(x_b @ w1_32 + b1p, 0.0)
    ref = h_ref.astype(jnp.bfloat16).astype(jnp.float32) @ w2_32 + b2p
    ref = ref[:, :num_classes]

    assert out.shape == (batch, num_classes)
    assert jnp.allclose(out, ref, atol=5e-3, rtol=5e-3)

    # Also sanity-check against the full-f32 math of the original module
    # (looser tolerance: bf16 weight/activation rounding).
    ref_f32 = jnp.maximum(x @ w1 + b1, 0.0) @ w2 + b2
    assert jnp.allclose(out, ref_f32, atol=5e-2, rtol=5e-2)

    print("KERNEL_OK")
</pallas_src>

<mosaic_0001>
module attributes {stable_mosaic.version = 11 : i64} {
  func.func @mlp_kernel(%arg0: i32, %arg1: memref<64x784xf32, #tpu.memory_space<vmem>>, %arg2: memref<784x128xbf16, #tpu.memory_space<vmem>>, %arg3: memref<1x128xf32, #tpu.memory_space<vmem>>, %arg4: memref<128x128xbf16, #tpu.memory_space<vmem>>, %arg5: memref<1x128xf32, #tpu.memory_space<vmem>>, %arg6: memref<64x128xf32, #tpu.memory_space<vmem>>) attributes {dimension_semantics = [#tpu.dimension_semantics<parallel>], iteration_bounds = array<i64: 1>, scalar_prefetch = 0 : i64, scratch_operands = 0 : i64, tpu.core_type = #tpu.core_type<tc>, window_params = [{transform_indices = @transform_0, window_bounds = array<i64: 64, 784>}, {pipeline_mode = #tpu.pipeline_mode<synchronous>, transform_indices = @transform_1, window_bounds = array<i64: 784, 128>}, {pipeline_mode = #tpu.pipeline_mode<synchronous>, transform_indices = @transform_2, window_bounds = array<i64: 1, 128>}, {pipeline_mode = #tpu.pipeline_mode<synchronous>, transform_indices = @transform_3, window_bounds = array<i64: 128, 128>}, {pipeline_mode = #tpu.pipeline_mode<synchronous>, transform_indices = @transform_4, window_bounds = array<i64: 1, 128>}, {transform_indices = @transform_5, window_bounds = array<i64: 64, 128>}]} {
    %c0 = arith.constant 0 : index
    %c0_0 = arith.constant 0 : index
    %0 = vector.load %arg1[%c0, %c0_0] : memref<64x784xf32, #tpu.memory_space<vmem>>, vector<64x784xf32>
    %1 = arith.truncf %0 : vector<64x784xf32> to vector<64x784xbf16>
    %c0_1 = arith.constant 0 : index
    %c0_2 = arith.constant 0 : index
    %2 = vector.load %arg2[%c0_1, %c0_2] : memref<784x128xbf16, #tpu.memory_space<vmem>>, vector<784x128xbf16>
    %cst = arith.constant dense<0.000000e+00> : vector<64x128xf32>
    %3 = tpu.matmul %1, %2, %cst {dimension_numbers = #tpu.dot_dimension_numbers<[1], [0], [0], [1], [0, 0, 1, 1], [], []>} : vector<64x784xbf16>, vector<784x128xbf16>, vector<64x128xf32> -> vector<64x128xf32>
    %c0_3 = arith.constant 0 : index
    %c0_4 = arith.constant 0 : index
    %4 = vector.load %arg3[%c0_3, %c0_4] : memref<1x128xf32, #tpu.memory_space<vmem>>, vector<1x128xf32>
    %5 = vector.broadcast %4 : vector<1x128xf32> to vector<64x128xf32>
    %6 = arith.addf %3, %5 : vector<64x128xf32>
    %cst_5 = arith.constant 0.000000e+00 : f32
    %7 = vector.broadcast %cst_5 : f32 to vector<64x128xf32>
    %8 = arith.maximumf %6, %7 : vector<64x128xf32>
    %9 = arith.truncf %8 : vector<64x128xf32> to vector<64x128xbf16>
    %c0_6 = arith.constant 0 : index
    %c0_7 = arith.constant 0 : index
    %10 = vector.load %arg4[%c0_6, %c0_7] : memref<128x128xbf16, #tpu.memory_space<vmem>>, vector<128x128xbf16>
    %cst_8 = arith.constant dense<0.000000e+00> : vector<64x128xf32>
    %11 = tpu.matmul %9, %10, %cst_8 {dimension_numbers = #tpu.dot_dimension_numbers<[1], [0], [0], [1], [0, 0, 1, 1], [], []>} : vector<64x128xbf16>, vector<128x128xbf16>, vector<64x128xf32> -> vector<64x128xf32>
    %c0_9 = arith.constant 0 : index
    %c0_10 = arith.constant 0 : index
    %12 = vector.load %arg5[%c0_9, %c0_10] : memref<1x128xf32, #tpu.memory_space<vmem>>, vector<1x128xf32>
    %13 = vector.broadcast %12 : vector<1x128xf32> to vector<64x128xf32>
    %14 = arith.addf %11, %13 : vector<64x128xf32>
    %c0_11 = arith.constant 0 : index
    %c0_12 = arith.constant 0 : index
    %15 = vector.load %arg6[%c0_11, %c0_12] : memref<64x128xf32, #tpu.memory_space<vmem>>, vector<64x128xf32>
    tpu.vector_store %arg6[%c0_11, %c0_12], %14 {strides = array<i32>} : memref<64x128xf32, #tpu.memory_space<vmem>>, vector<64x128xf32>,
    return
  }
  func.func @transform_0(%arg0: i32) -> (i32, i32) {
    %c0_i32 = arith.constant 0 : i32
    %c0_i32_0 = arith.constant 0 : i32
    return %arg0, %c0_i32 : i32, i32
  }
  func.func @transform_1(%arg0: i32) -> (i32, i32) {
    %c0_i32 = arith.constant 0 : i32
    %c0_i32_0 = arith.constant 0 : i32
    %c0_i32_1 = arith.constant 0 : i32
    return %c0_i32, %c0_i32_0 : i32, i32
  }
  func.func @transform_2(%arg0: i32) -> (i32, i32) {
    %c0_i32 = arith.constant 0 : i32
    %c0_i32_0 = arith.constant 0 : i32
    %c0_i32_1 = arith.constant 0 : i32
    return %c0_i32, %c0_i32_0 : i32, i32
  }
  func.func @transform_3(%arg0: i32) -> (i32, i32) {
    %c0_i32 = arith.constant 0 : i32
    %c0_i32_0 = arith.constant 0 : i32
    %c0_i32_1 = arith.constant 0 : i32
    return %c0_i32, %c0_i32_0 : i32, i32
  }
  func.func @transform_4(%arg0: i32) -> (i32, i32) {
    %c0_i32 = arith.constant 0 : i32
    %c0_i32_0 = arith.constant 0 : i32
    %c0_i32_1 = arith.constant 0 : i32
    return %c0_i32, %c0_i32_0 : i32, i32
  }
  func.func @transform_5(%arg0: i32) -> (i32, i32) {
    %c0_i32 = arith.constant 0 : i32
    %c0_i32_0 = arith.constant 0 : i32
    return %arg0, %c0_i32 : i32, i32
  }
}

</mosaic_0001>

<bundles_post_ra>
// kernel: mlp_forward.1
= control target key start
LH: loop header
LB: loop body
LE: loop exit
PB: predicated region body
PF: predicated region fallthrough
CT: control target
= control target key end

     0   :  { %10 = vsyncpa [#allocation3], 0  ;;  %s1477_s0 = inlined_call_operand.hbm [shape: f32[64,784], index: 0, kind: input, shape index: {}]   ;;  %s1478_s1 = inlined_call_operand.hbm [shape: bf16[784,128], index: 1, kind: input, shape index: {}]   ;;  %s1479_s2 = inlined_call_operand.vmem [shape: f32[1,128], index: 2, kind: input, shape index: {}]   ;;  %s1480_s3 = inlined_call_operand.hbm [shape: bf16[128,128], index: 3, kind: input, shape index: {}]   ;;  %s1481_s4 = inlined_call_operand.vmem [shape: f32[1,128], index: 4, kind: input, shape index: {}]   ;;  %s1482_s5 = inlined_call_operand.vmem [shape: f32[64,128], index: 5, kind: output, shape index: {}]  }
   0x1   :  { %11 = vsyncpa [#allocation5], 0  ;;  %s1364_s18 = smov [#allocation4]   ;;  %s1294_s22 = scalar_lea.hbm %s1478_s1, 6272 }
   0x2   :  { %s29_s19 = sshll.u32 %s1364_s18, 4  ;;  %p1295_p0 = scmp.ne.s32.totalorder %s1478_s1, %s1294_s22  ;;  %s30_s19 = int_to_ptr.vmem [resolvable:$true] %s29_s19 }
   0x3   :  { %p1298_p1 = scmp.lt.u32.totalorder %s1294_s22, %s1478_s1 }
   0x5   :  { %p1300_p2 = pnand %p1298_p1, %p1295_p0 }
   0x7   :  { %1303 = shalt.err (!%p1300_p2)
}
   0x8   :  { %s1304_s27 = scalar_lea.vmem %s30_s19, 6272  ;;  %p1309_p4 = scmp.lt.s32.totalorder %s30_s19, %s30_s19 }
   0x9   :  { %p1305_p3 = scmp.ne.s32.totalorder %s30_s19, %s1304_s27  ;;  %p1310_p5 = scmp.lt.s32.totalorder %s1304_s27, %s1304_s27 }
   0xb   :  { %p1311_p6 = por %p1310_p5, %p1309_p4 }
   0xd   :  { %p1312_p7 = pnand %p1311_p6, %p1305_p3 }
   0xf   :  { %1315 = shalt.err (!%p1312_p7)
}
  0x10   :  { %s1365_s28 = smov 64   ;;  %s1366_s29 = smov 4  }
  0x11   :  { %35 = dma.hbm_to_vmem [thread:$0]  %s1478_s1, 6272, %s30_s19, [#allocation5], %s1365_s28, %s1365_s28, %s1366_s29  }
  0x12   :  { %s1367_s7 = smov [#allocation2]   ;;  %s1316_s11 = scalar_lea.hbm %s1477_s0, 7168 }
  0x13   :  { %s17_s8 = sshll.u32 %s1367_s7, 4  ;;  %p1317_p8 = scmp.ne.s32.totalorder %s1477_s0, %s1316_s11  ;;  %s18_s8 = int_to_ptr.vmem [resolvable:$true] %s17_s8 }
  0x14   :  { %p1320_p9 = scmp.lt.u32.totalorder %s1316_s11, %s1477_s0 }
  0x16   :  { %p1322_p10 = pnand %p1320_p9, %p1317_p8 }
  0x18   :  { %1325 = shalt.err (!%p1322_p10)
}
  0x19   :  { %s1326_s16 = scalar_lea.vmem %s18_s8, 7168  ;;  %p1331_p12 = scmp.lt.s32.totalorder %s18_s8, %s18_s8 }
  0x1a   :  { %p1327_p11 = scmp.ne.s32.totalorder %s18_s8, %s1326_s16  ;;  %p1332_p13 = scmp.lt.s32.totalorder %s1326_s16, %s1326_s16 }
  0x1c   :  { %p1333_p0 = por %p1332_p13, %p1331_p12 }
  0x1e   :  { %p1334_p1 = pnand %p1333_p0, %p1327_p11 }
  0x20   :  { %1337 = shalt.err (!%p1334_p1)
}
  0x21   :  { %s1368_s1 = smov 896   ;;  %s1369_s17 = smov 56  }
  0x22   :  { %23 = dma.hbm_to_vmem [thread:$0]  %s1477_s0, 7168, %s18_s8, [#allocation3], %s1368_s1, %s1368_s1, %s1369_s17  }
  0x23   :  { %s1370_s20 = smov [#allocation6]   ;;  %s1338_s24 = scalar_lea.hbm %s1480_s3, 1024 }
  0x24   :  { %s43_s21 = sshll.u32 %s1370_s20, 4  ;;  %p1339_p2 = scmp.ne.s32.totalorder %s1480_s3, %s1338_s24  ;;  %s44_s21 = int_to_ptr.vmem [resolvable:$true] %s43_s21 }
  0x25   :  { %p1342_p3 = scmp.lt.u32.totalorder %s1338_s24, %s1480_s3 }
  0x27   :  { %p1344_p4 = pnand %p1342_p3, %p1339_p2 }
  0x29   :  { %1347 = shalt.err (!%p1344_p4)
}
  0x2a   :  { %s1348_s6 = scalar_lea.vmem %s44_s21, 1024  ;;  %p1353_p6 = scmp.lt.s32.totalorder %s44_s21, %s44_s21 }
  0x2b   :  { %p1349_p5 = scmp.ne.s32.totalorder %s44_s21, %s1348_s6  ;;  %p1354_p7 = scmp.lt.s32.totalorder %s1348_s6, %s1348_s6 }
  0x2d   :  { %p1355_p8 = por %p1354_p7, %p1353_p6 }
  0x2f   :  { %p1356_p9 = pnand %p1355_p8, %p1349_p5 }
  0x31   :  { %1359 = shalt.err (!%p1356_p9)
}
  0x32   :  { %49 = dma.hbm_to_vmem [thread:$0]  %s1480_s3, 1024, %s44_s21, [#allocation5], %s1365_s28, %s1365_s28, %s1366_s29  }
  0x33   :  { %1360 = dma.done.wait [#allocation3], 7168  }
  0x34   :  { %1361 = vsyncadd [#allocation3], 4294960128 }
  0x35   :  { %1362 = dma.done.wait [#allocation5], 7296  }
  0x36   :  { %1363 = vsyncadd [#allocation5], 4294960000  ;;  %v1237_v0 = vld [vmem:[#allocation4 + $0x40] sm:$0xff]   ;;  %v1241_v4 = vld [vmem:[#allocation4 + $0x48] sm:$0xff]   ;;  %vm545_vm0 = vcmask 130048  }
  0x37   :  { %v1238_v1 = vld [vmem:[#allocation4] sm:$0xff]   ;;  %1043 = vmatprep.subr.bf16.mxu0 %v1237_v0  ;;  %v1242_v5 = vld [vmem:[#allocation4 + $0x8] sm:$0xff]   ;;  %v1245_v8 = vld [vmem:[#allocation4 + $0x50] sm:$0xff]  }
  0x38   :  { %v1239_v2 = vld [vmem:[#allocation4 + $0xc0] sm:$0xff]   ;;  %1044 = vmatpush3.bf16.msra.mxu0 %v1238_v1  ;;  %v1243_v6 = vld [vmem:[#allocation4 + $0xc8] sm:$0xff]   ;;  %v1246_v9 = vld [vmem:[#allocation4 + $0x10] sm:$0xff]  }
  0x39   :  { %v1240_v3 = vld [vmem:[#allocation4 + $0x80] sm:$0xff]   ;;  %1083 = vmatprep.subr.bf16.mxu1 %v1239_v2  ;;  %1045 = vmatprep.subr.bf16.mxu0 %v1241_v4  ;;  %v1244_v7 = vld [vmem:[#allocation4 + $0x88] sm:$0xff]   ;;  %v1247_v10 = vld [vmem:[#allocation4 + $0xd0] sm:$0xff]  }
  0x3a   :  { %1084 = vmatpush3.bf16.msra.mxu1 %v1240_v3  ;;  %v1248_v11 = vld [vmem:[#allocation4 + $0x90] sm:$0xff]   ;;  %v1249_v12 = vld [vmem:[#allocation4 + $0x58] sm:$0xff]   ;;  %v1253_v16 = vld [vmem:[#allocation4 + $0x60] sm:$0xff]  }
  0x3b   :  { %1085 = vmatprep.subr.bf16.mxu1 %v1243_v6  ;;  %v1250_v13 = vld [vmem:[#allocation4 + $0x18] sm:$0xff]   ;;  %v1254_v17 = vld [vmem:[#allocation4 + $0x20] sm:$0xff]   ;;  %v1257_v20 = vld [vmem:[#allocation4 + $0x68] sm:$0xff]  }
  0x3c   :  { %1046 = vmatpush3.bf16.msra.mxu0 %v1242_v5  ;;  %v1251_v14 = vld [vmem:[#allocation4 + $0xd8] sm:$0xff]   ;;  %v1255_v18 = vld [vmem:[#allocation4 + $0xe0] sm:$0xff]   ;;  %v1258_v21 = vld [vmem:[#allocation4 + $0x28] sm:$0xff]  }
  0x3d   :  { %1047 = vmatprep.subr.bf16.mxu0 %v1245_v8  ;;  %v1252_v15 = vld [vmem:[#allocation4 + $0x98] sm:$0xff]   ;;  %v1256_v19 = vld [vmem:[#allocation4 + $0xa0] sm:$0xff]   ;;  %v1259_v22 = vld [vmem:[#allocation4 + $0xe8] sm:$0xff]  }
  0x3e   :  { %1086 = vmatpush3.bf16.msra.mxu1 %v1244_v7  ;;  %v1260_v23 = vld [vmem:[#allocation4 + $0xa8] sm:$0xff]   ;;  %v1261_v24 = vld [vmem:[#allocation4 + $0x70] sm:$0xff]   ;;  %v1265_v28 = vld [vmem:[#allocation4 + $0x78] sm:$0xff]  }
  0x3f   :  { %1087 = vmatprep.subr.bf16.mxu1 %v1247_v10  ;;  %v1262_v25 = vld [vmem:[#allocation4 + $0x30] sm:$0xff]   ;;  %v1266_v29 = vld [vmem:[#allocation4 + $0x38] sm:$0xff]   ;;  %v63_v31 = vld [vmem:[#allocation2 + $0x8] sm:$0xff] }
  0x40   :  { %1048 = vmatpush3.bf16.msra.mxu0 %v1246_v9  ;;  %v1263_v26 = vld [vmem:[#allocation4 + $0xf0] sm:$0xff]   ;;  %v1267_v30 = vld [vmem:[#allocation4 + $0xf8] sm:$0xff]   ;;  %v70_v32 = vld [vmem:[#allocation2 + $0x40] sm:$0xff] }
  0x41   :  { %1049 = vmatprep.subr.bf16.mxu0 %v1249_v12  ;;  %v1264_v27 = vld [vmem:[#allocation4 + $0xb0] sm:$0xff]   ;;  %v119_v33 = vpack.c.bf16 %v70_v32, %v63_v31  ;;  %v1268_v34 = vld [vmem:[#allocation4 + $0xb8] sm:$0xff]   ;;  %v62_v35 = vld [vmem:[#allocation2] sm:$0xff] }
  0x42   :  { %1088 = vmatpush3.bf16.msra.mxu1 %v1248_v11  ;;  %v69_v36 = vld [vmem:[#allocation2 + $0x38] sm:$0xff]  ;;  %v1269_v38 = vld [vmem:[#allocation4 + $0x140] sm:$0xff]   ;;  %v72_v40 = vld [vmem:[#allocation2 + $0x50] sm:$0xff] }
  0x43   :  { %1089 = vmatprep.subr.bf16.mxu1 %v1251_v14  ;;  %590 = vmatprep.mubr.bf16.mxu0 %v119_v33  ;;  %v118_v37 = vpack.c.bf16 %v69_v36, %v62_v35  ;;  %v65_v39 = vld [vmem:[#allocation2 + $0x18] sm:$0xff]  ;;  %v1270_v42 = vld [vmem:[#allocation4 + $0x100] sm:$0xff]   ;;  %v64_v43 = vld [vmem:[#allocation2 + $0x10] sm:$0xff] }
  0x44   :  { %1050 = vmatpush3.bf16.msra.mxu0 %v1250_v13  ;;  %v121_v41 = vpack.c.bf16 %v72_v40, %v65_v39  ;;  %v71_v44 = vld [vmem:[#allocation2 + $0x48] sm:$0xff]  ;;  %v77_v48 = vld [vmem:[#allocation2 + $0x78] sm:$0xff]  ;;  %v84_v49 = vld [vmem:[#allocation2 + $0xb0] sm:$0xff] }
  0x45   :  { %1051 = vmatprep.subr.bf16.mxu0 %v1253_v16  ;;  %v120_v45 = vpack.c.bf16 %v71_v44, %v64_v43  ;;  %v1271_v46 = vld [vmem:[#allocation4 + $0x148] sm:$0xff]   ;;  %v76_v50 = vld [vmem:[#allocation2 + $0x70] sm:$0xff]  ;;  %v126_v52 = vpack.c.bf16 %v84_v49, %v77_v48  ;;  %v86_v56 = vld [vmem:[#allocation2 + $0xc0] sm:$0xff] }
  0x46   :  { %1090 = vmatpush3.bf16.msra.mxu1 %v1252_v15  ;;  %655 = vmatprep.mubr.bf16.mxu1 %v121_v41  ;;  %v1272_v47 = vld [vmem:[#allocation4 + $0x108] sm:$0xff]   ;;  %v1273_v54 = vld [vmem:[#allocation4 + $0x150] sm:$0xff]   ;;  %v78_v59 = vld [vmem:[#allocation2 + $0x80] sm:$0xff] }
  0x47   :  { %1091 = vmatprep.subr.bf16.mxu1 %v1255_v18  ;;  %v83_v51 = vld [vmem:[#allocation2 + $0xa8] sm:$0xff]  ;;  %v1274_v58 = vld [vmem:[#allocation4 + $0x110] sm:$0xff]   ;;  %v85_v60 = vld [vmem:[#allocation2 + $0xb8] sm:$0xff] }
  0x48   :  { %1052 = vmatpush3.bf16.msra.mxu0 %v1254_v17  ;;  %v125_v53 = vpack.c.bf16 %v83_v51, %v76_v50  ;;  %v79_v55 = vld [vmem:[#allocation2 + $0x88] sm:$0xff]  ;;  %v127_v61 = vpack.c.bf16 %v85_v60, %v78_v59  ;;  %v1275_v62 = vld [vmem:[#allocation4 + $0x158] sm:$0xff]   ;;  %v98_v1 = vld [vmem:[#allocation2 + $0x120] sm:$0xff] }
  0x49   :  { %1053 = vmatprep.subr.bf16.mxu0 %v1257_v20  ;;  %v128_v57 = vpack.c.bf16 %v86_v56, %v79_v55  ;;  %v1276_v63 = vld [vmem:[#allocation4 + $0x118] sm:$0xff]   ;;  %v91_v0 = vld [vmem:[#allocation2 + $0xe8] sm:$0xff]  ;;  %v90_v3 = vld [vmem:[#allocation2 + $0xe0] sm:$0xff] }
  0x4a   :  { %1092 = vmatpush3.bf16.msra.mxu1 %v1256_v19  ;;  %v133_v2 = vpack.c.bf16 %v98_v1, %v91_v0  ;;  %v97_v4 = vld [vmem:[#allocation2 + $0x118] sm:$0xff]  ;;  %v1277_v5 = vld [vmem:[#allocation4 + $0x160] sm:$0xff]   ;;  %v100_v8 = vld [vmem:[#allocation2 + $0x130] sm:$0xff] }
  0x4b   :  { %1093 = vmatprep.subr.bf16.mxu1 %v1259_v22  ;;  %v93_v6 = vld [vmem:[#allocation2 + $0xf8] sm:$0xff]  ;;  %v132_v7 = vpack.c.bf16 %v97_v4, %v90_v3  ;;  %v1278_v10 = vld [vmem:[#allocation4 + $0x120] sm:$0xff]   ;;  %v92_v11 = vld [vmem:[#allocation2 + $0xf0] sm:$0xff] }
  0x4c   :  { %1054 = vmatpush3.bf16.msra.mxu0 %v1258_v21  ;;  %v135_v9 = vpack.c.bf16 %v100_v8, %v93_v6  ;;  %v99_v12 = vld [vmem:[#allocation2 + $0x128] sm:$0xff]  ;;  %v1279_v13 = vld [vmem:[#allocation4 + $0x180] sm:$0xff]   ;;  %v105_v17 = vld [vmem:[#allocation2 + $0x158] sm:$0xff] }
  0x4d   :  { %1055 = vmatprep.subr.bf16.mxu0 %v1261_v24  ;;  %v134_v14 = vpack.c.bf16 %v99_v12, %v92_v11  ;;  %v1280_v15 = vld [vmem:[#allocation4 + $0x168] sm:$0xff]   ;;  %v112_v18 = vld [vmem:[#allocation2 + $0x190] sm:$0xff]  ;;  %v114_v24 = vld [vmem:[#allocation2 + $0x1a0] sm:$0xff] }
  0x4e   :  { %1094 = vmatpush3.bf16.msra.mxu1 %v1260_v23  ;;  %v1281_v16 = vld [vmem:[#allocation4 + $0x128] sm:$0xff]   ;;  %v104_v19 = vld [vmem:[#allocation2 + $0x150] sm:$0xff]  ;;  %v140_v20 = vpack.c.bf16 %v112_v18, %v105_v17  ;;  %v1285_v33 = vld [vmem:[#allocation4 + $0x138] sm:$0xff]  }
  0x4f   :  { %1095 = vmatprep.subr.bf16.mxu1 %v1263_v26  ;;  %v111_v21 = vld [vmem:[#allocation2 + $0x188] sm:$0xff]  ;;  %v1282_v22 = vld [vmem:[#allocation4 + $0x170] sm:$0xff]   ;;  %v66_v35 = vld [vmem:[#allocation2 + $0x20] sm:$0xff] }
  0x50   :  { %1056 = vmatpush3.bf16.msra.mxu0 %v1262_v25  ;;  %v107_v23 = vld [vmem:[#allocation2 + $0x168] sm:$0xff]  ;;  %v139_v25 = vpack.c.bf16 %v111_v21, %v104_v19  ;;  %v81_v41 = vld [vmem:[#allocation2 + $0x98] sm:$0xff]  ;;  %v82_v44 = vld [vmem:[#allocation2 + $0xa0] sm:$0xff] }
  0x51   :  { %1057 = vmatprep.subr.bf16.mxu0 %v1265_v28  ;;  %v142_v26 = vpack.c.bf16 %v114_v24, %v107_v23  ;;  %v106_v28 = vld [vmem:[#allocation2 + $0x160] sm:$0xff]  ;;  %v67_v32 = vld [vmem:[#allocation2 + $0x28] sm:$0xff]  ;;  %v80_v50 = vld [vmem:[#allocation2 + $0x90] sm:$0xff] }
  0x52   :  { %1096 = vmatpush3.bf16.msra.mxu1 %v1264_v27  ;;  %v1283_v27 = vld [vmem:[#allocation4 + $0x130] sm:$0xff]   ;;  %v75_v39 = vld [vmem:[#allocation2 + $0x68] sm:$0xff]  ;;  %v110_v55 = vld [vmem:[#allocation2 + $0x180] sm:$0xff] }
  0x53   :  { %1097 = vmatprep.subr.bf16.mxu1 %v1267_v30  ;;  %v1284_v30 = vld [vmem:[#allocation4 + $0x178] sm:$0xff]   ;;  %v103_v48 = vld [vmem:[#allocation2 + $0x148] sm:$0xff]  ;;  %v94_v60 = vld [vmem:[#allocation2 + $0x100] sm:$0xff] }
  0x54   :  { %1058 = vmatpush3.bf16.msra.mxu0 %v1266_v29  ;;  %v113_v29 = vld [vmem:[#allocation2 + $0x198] sm:$0xff]  ;;  %v87_v51 = vld [vmem:[#allocation2 + $0xc8] sm:$0xff]  ;;  %v1287_v6 = vld [vmem:[#allocation6 + $0x8] sm:$0xff]  }
  0x55   :  { %1123 = vmatprep.subr.bf16.mxu0 %v1269_v38  ;;  %v141_v31 = vpack.c.bf16 %v113_v29, %v106_v28  ;;  %v68_v38 = vld [vmem:[#allocation2 + $0x30] sm:$0xff]  ;;  %v117_v56 = vld [vmem:[#allocation2 + $0x1b8] sm:$0xff]  ;;  %v115_v3 = vld [vmem:[#allocation2 + $0x1a8] sm:$0xff] }
  0x56   :  { %1098 = vmatpush3.bf16.msra.mxu1 %v1268_v34  ;;  %v74_v34 = vld [vmem:[#allocation2 + $0x60] sm:$0xff]  ;;  %v124_v40 = vpack.c.bf16 %v75_v39, %v68_v38  ;;  %v145_v59 = vpack.c.bf16 %v117_v56, %v110_v55  ;;  %v1292_v11 = vld [vmem:[#allocation6 + $0x30] sm:$0xff]  }
  0x57   :  { %591 = vmatmul.mubr.bf16.vlgmr.msra.gmra.mrb[0].mxu0 %v118_v37  ;;  %1180 = vmatprep.subr.bf16.mxu1 %v1279_v13  ;;  %v123_v36 = vpack.c.bf16 %v74_v34, %v67_v32  ;;  %v73_v37 = vld [vmem:[#allocation2 + $0x58] sm:$0xff]  ;;  %v1289_v8 = vld [vmem:[#allocation6 + $0x18] sm:$0xff]  }
  0x58   :  { %1124 = vmatpush3.bf16.msra.mxu0 %v1270_v42  ;;  %598 = vmatprep.mubr.bf16.mxu0 %v126_v52  ;;  %v88_v42 = vld [vmem:[#allocation2 + $0xd0] sm:$0xff]  ;;  %v122_v43 = vpack.c.bf16 %v73_v37, %v66_v35  ;;  %v95_v52 = vld [vmem:[#allocation2 + $0x108] sm:$0xff]  ;;  %v1293_v12 = vld [vmem:[#allocation6 + $0x38] sm:$0xff]  }
  0x59   :  { %656 = vmatmul.mubr.bf16.vlgmr.msra.gmra.mrb[0].mxu1 %v120_v45  ;;  %1125 = vmatprep.subr.bf16.mxu0 %v1271_v46  ;;  %v89_v45 = vld [vmem:[#allocation2 + $0xd8] sm:$0xff]  ;;  %v130_v46 = vpack.c.bf16 %v88_v42, %v81_v41 }
  0x5a   :  { %663 = vmatprep.mubr.bf16.mxu1 %v128_v57  ;;  %1181 = vmatpush3.bf16.msra.mxu1 %v1279_v13  ;;  %v131_v49 = vpack.c.bf16 %v89_v45, %v82_v44  ;;  %v129_v57 = vpack.c.bf16 %v87_v51, %v80_v50 }
  0x5c   :  { %1126 = vmatpush3.bf16.msra.mxu0 %v1272_v47  ;;  %v96_v47 = vld [vmem:[#allocation2 + $0x110] sm:$0xff] }
  0x5d   :  { %1127 = vmatprep.subr.bf16.mxu0 %v1273_v54  ;;  %v138_v54 = vpack.c.bf16 %v103_v48, %v96_v47 }
  0x5f   :  { %599 = vmatmul.mubr.bf16.gmra.mrb[4].mxu0 %v125_v53  ;;  %v102_v53 = vld [vmem:[#allocation2 + $0x140] sm:$0xff] }
  0x60   :  { %1128 = vmatpush3.bf16.msra.mxu0 %v1274_v58  ;;  %606 = vmatprep.mubr.bf16.mxu0 %v133_v2  ;;  %v137_v58 = vpack.c.bf16 %v102_v53, %v95_v52  ;;  %v108_v2 = vld [vmem:[#allocation2 + $0x170] sm:$0xff] }
  0x61   :  { %1129 = vmatprep.subr.bf16.mxu0 %v1275_v62  ;;  %664 = vmatmul.mubr.bf16.gmra.mrb[4].mxu1 %v127_v61  ;;  %v101_v61 = vld [vmem:[#allocation2 + $0x138] sm:$0xff]  ;;  %v143_v4 = vpack.c.bf16 %v115_v3, %v108_v2 }
  0x62   :  { %671 = vmatprep.mubr.bf16.mxu1 %v135_v9  ;;  %v109_v62 = vld [vmem:[#allocation2 + $0x178] sm:$0xff]  ;;  %v136_v0 = vpack.c.bf16 %v101_v61, %v94_v60  ;;  %v1290_v9 = vld [vmem:[#allocation6 + $0x20] sm:$0xff]  }
  0x64   :  { %1130 = vmatpush3.bf16.msra.mxu0 %v1276_v63  ;;  %v116_v63 = vld [vmem:[#allocation2 + $0x1b0] sm:$0xff] }
  0x65   :  { %1131 = vmatprep.subr.bf16.mxu0 %v1277_v5  ;;  %v144_v1 = vpack.c.bf16 %v116_v63, %v109_v62  ;;  %v1286_v5 = vld [vmem:[#allocation6] sm:$0xff]  }
  0x66   :  { %1214 = vmatprep.subr.bf16.mxu1 %v1286_v5 }
  0x67   :  { %607 = vmatmul.mubr.bf16.gmra.mrb[8].mxu0 %v132_v7  ;;  %v1288_v7 = vld [vmem:[#allocation6 + $0x10] sm:$0xff]  }
  0x68   :  { %1132 = vmatpush3.bf16.msra.mxu0 %v1278_v10  ;;  %614 = vmatprep.mubr.bf16.mxu0 %v140_v20  ;;  %v1291_v10 = vld [vmem:[#allocation6 + $0x28] sm:$0xff]  }
  0x69   :  { %1133 = vmatprep.subr.bf16.mxu0 %v1280_v15  ;;  %672 = vmatmul.mubr.bf16.gmra.mrb[8].mxu1 %v134_v14  ;;  %v980_v14 = vld [vmem:[%s1479_s2] ss:$0 sm:$0xff] }
  0x6a   :  { %679 = vmatprep.mubr.bf16.mxu1 %v142_v26 }
  0x6c   :  { %1134 = vmatpush3.bf16.msra.mxu0 %v1281_v16 }
  0x6d   :  { %1135 = vmatprep.subr.bf16.mxu0 %v1282_v22 }
  0x6f   :  { %615 = vmatmul.mubr.bf16.gmra.mrb[12].mxu0 %v139_v25 }
  0x70   :  { %1136 = vmatpush3.bf16.msra.mxu0 %v1283_v27  ;;  %720 = vmatprep.mubr.bf16.mxu0 %v123_v36 }
  0x71   :  { %1137 = vmatprep.subr.bf16.mxu0 %v1284_v30  ;;  %680 = vmatmul.mubr.bf16.gmra.mrb[12].mxu1 %v141_v31 }
  0x72   :  { %1182 = vmatprep.mubr.msk.bf16.mxu1 %vm545_vm0, %v124_v40 }
  0x74   :  { %1138 = vmatpush3.bf16.msra.mxu0 %v1285_v33 }
  0x75   :  { %1190 = vmatprep.subr.bf16.mxu0 %v1286_v5 }
  0x77   :  { %721 = vmatmul.mubr.bf16.vlgmr.msra.gmra.mrb[16].mxu0 %v122_v43 }
  0x78   :  { %728 = vmatprep.mubr.bf16.mxu0 %v130_v46  ;;  %1191 = vmatpush3.bf16.msra.mxu0 %v1286_v5 }
  0x79   :  { %1183 = vmatmul.mubr.msk.bf16.vlgmr.msra.gmra.mrb[16].mxu1 %vm545_vm0, %v131_v49  ;;  %1192 = vmatprep.subr.bf16.mxu0 %v1287_v6 }
  0x7a   :  { %1186 = vmatprep.mubr.msk.bf16.mxu1 %vm545_vm0, %v138_v54  ;;  %1222 = vmatpush3.bf16.msra.mxu1 %v1286_v5 }
  0x7b   :  { %1215 = vmatprep.subr.bf16.mxu1 %v1287_v6 }
  0x7c   :  { %1193 = vmatpush3.bf16.msra.mxu0 %v1287_v6 }
  0x7d   :  { %1194 = vmatprep.subr.bf16.mxu0 %v1288_v7 }
  0x7e   :  { %1223 = vmatpush3.bf16.msra.mxu1 %v1287_v6 }
  0x7f   :  { %729 = vmatmul.mubr.bf16.gmra.mrb[20].mxu0 %v129_v57  ;;  %1216 = vmatprep.subr.bf16.mxu1 %v1288_v7 }
  0x80   :  { %736 = vmatprep.mubr.bf16.mxu0 %v137_v58  ;;  %1195 = vmatpush3.bf16.msra.mxu0 %v1288_v7 }
  0x81   :  { %1187 = vmatmul.mubr.msk.bf16.gmra.mrb[20].mxu1 %vm545_vm0, %v145_v59  ;;  %1196 = vmatprep.subr.bf16.mxu0 %v1289_v8 }
  0x82   :  { %1224 = vmatpush3.bf16.msra.mxu1 %v1288_v7 }
  0x83   :  { %1217 = vmatprep.subr.bf16.mxu1 %v1289_v8 }
  0x84   :  { %1197 = vmatpush3.bf16.msra.mxu0 %v1289_v8 }
  0x85   :  { %1198 = vmatprep.subr.bf16.mxu0 %v1290_v9 }
  0x86   :  { %1225 = vmatpush3.bf16.msra.mxu1 %v1289_v8 }
  0x87   :  { %737 = vmatmul.mubr.bf16.gmra.mrb[24].mxu0 %v136_v0  ;;  %1218 = vmatprep.subr.bf16.mxu1 %v1290_v9 }
  0x88   :  { %744 = vmatprep.mubr.bf16.mxu0 %v144_v1  ;;  %1199 = vmatpush3.bf16.msra.mxu0 %v1290_v9 }
  0x89   :  { %1200 = vmatprep.subr.bf16.mxu0 %v1291_v10 }
  0x8a   :  { %1226 = vmatpush3.bf16.msra.mxu1 %v1290_v9 }
  0x8b   :  { %1219 = vmatprep.subr.bf16.mxu1 %v1291_v10 }
  0x8c   :  { %1201 = vmatpush3.bf16.msra.mxu0 %v1291_v10 }
  0x8d   :  { %1202 = vmatprep.subr.bf16.mxu0 %v1292_v11 }
  0x8e   :  { %1227 = vmatpush3.bf16.msra.mxu1 %v1291_v10 }
  0x8f   :  { %745 = vmatmul.mubr.bf16.gmra.mrb[28].mxu0 %v143_v4  ;;  %1220 = vmatprep.subr.bf16.mxu1 %v1292_v11 }
  0x90   :  { %1203 = vmatpush3.bf16.msra.mxu0 %v1292_v11 }
  0x91   :  { %1204 = vmatprep.subr.bf16.mxu0 %v1293_v12 }
  0x92   :  { %1228 = vmatpush3.bf16.msra.mxu1 %v1292_v11 }
  0x93   :  { %1221 = vmatprep.subr.bf16.mxu1 %v1293_v12 }
  0x94   :  { %1205 = vmatpush3.bf16.msra.mxu0 %v1293_v12 }
  0x96   :  { %1229 = vmatpush3.bf16.msra.mxu1 %v1293_v12 }
 0x12a   :  { %v1059_v13 = vpop.f32.mrb[0].mxu0 }
 0x12b   :  { %v1060_v15 = vpop.f32.mrb[1].mxu0 }
 0x12c   :  { %v1061_v16 = vadd.f32 %v1060_v15, %v1059_v13  ;;  %v1062_v17 = vpop.f32.mrb[2].mxu0  ;;  %v1099_v18 = vpop.f32.mrb[0].mxu1 }
 0x12d   :  { %v1063_v19 = vpop.f32.mrb[3].mxu0  ;;  %v1100_v22 = vpop.f32.mrb[1].mxu1 }
 0x12e   :  { %v593_v20 = vadd.f32 %v1061_v16, %v980_v14  ;;  %v1064_v21 = vadd.f32 %v1063_v19, %v1062_v17  ;;  %v1101_v23 = vadd.f32 %v1100_v22, %v1099_v18  ;;  %v1102_v24 = vpop.f32.mrb[2].mxu1 }
 0x12f   :  { %v1103_v26 = vpop.f32.mrb[3].mxu1 }
 0x130   :  { %v596_v25 = vadd.f32 %v1064_v21, %v980_v14  ;;  %v658_v27 = vadd.f32 %v1101_v23, %v593_v20  ;;  %v1104_v28 = vadd.f32 %v1103_v26, %v1102_v24 }
 0x132   :  { %v1065_v29 = vpop.f32.mrb[4].mxu0  ;;  %v661_v30 = vadd.f32 %v1104_v28, %v596_v25 }
 0x133   :  { %v1066_v31 = vpop.f32.mrb[5].mxu0 }
 0x134   :  { %v1067_v32 = vadd.f32 %v1066_v31, %v1065_v29  ;;  %v1068_v33 = vpop.f32.mrb[6].mxu0  ;;  %v1105_v34 = vpop.f32.mrb[4].mxu1 }
 0x135   :  { %v1069_v35 = vpop.f32.mrb[7].mxu0  ;;  %v1106_v38 = vpop.f32.mrb[5].mxu1 }
 0x136   :  { %v601_v36 = vadd.f32 %v1067_v32, %v980_v14  ;;  %v1070_v37 = vadd.f32 %v1069_v35, %v1068_v33  ;;  %v1107_v39 = vadd.f32 %v1106_v38, %v1105_v34  ;;  %v1108_v40 = vpop.f32.mrb[6].mxu1 }
 0x137   :  { %v1109_v42 = vpop.f32.mrb[7].mxu1 }
 0x138   :  { %v604_v41 = vadd.f32 %v1070_v37, %v980_v14  ;;  %v666_v43 = vadd.f32 %v1107_v39, %v601_v36  ;;  %v1110_v44 = vadd.f32 %v1109_v42, %v1108_v40 }
 0x13a   :  { %v1071_v45 = vpop.f32.mrb[8].mxu0  ;;  %v669_v46 = vadd.f32 %v1110_v44, %v604_v41 }
 0x13b   :  { %v1072_v47 = vpop.f32.mrb[9].mxu0 }
 0x13c   :  { %v1073_v48 = vadd.f32 %v1072_v47, %v1071_v45  ;;  %v1074_v49 = vpop.f32.mrb[10].mxu0  ;;  %v1111_v50 = vpop.f32.mrb[8].mxu1 }
 0x13d   :  { %v1075_v51 = vpop.f32.mrb[11].mxu0  ;;  %v1112_v54 = vpop.f32.mrb[9].mxu1 }
 0x13e   :  { %v609_v52 = vadd.f32 %v1073_v48, %v980_v14  ;;  %v1076_v53 = vadd.f32 %v1075_v51, %v1074_v49  ;;  %v1113_v55 = vadd.f32 %v1112_v54, %v1111_v50  ;;  %v1114_v56 = vpop.f32.mrb[10].mxu1 }
 0x13f   :  { %v1115_v58 = vpop.f32.mrb[11].mxu1 }
 0x140   :  { %v612_v57 = vadd.f32 %v1076_v53, %v980_v14  ;;  %v674_v59 = vadd.f32 %v1113_v55, %v609_v52  ;;  %v1116_v60 = vadd.f32 %v1115_v58, %v1114_v56 }
 0x142   :  { %v1077_v61 = vpop.f32.mrb[12].mxu0  ;;  %v677_v62 = vadd.f32 %v1116_v60, %v612_v57 }
 0x143   :  { %v1078_v63 = vpop.f32.mrb[13].mxu0 }
 0x144   :  { %v1079_v0 = vadd.f32 %v1078_v63, %v1077_v61  ;;  %v1080_v1 = vpop.f32.mrb[14].mxu0  ;;  %v1117_v2 = vpop.f32.mrb[12].mxu1 }
 0x145   :  { %v1081_v3 = vpop.f32.mrb[15].mxu0  ;;  %v1118_v6 = vpop.f32.mrb[13].mxu1 }
 0x146   :  { %v617_v4 = vadd.f32 %v1079_v0, %v980_v14  ;;  %v1082_v5 = vadd.f32 %v1081_v3, %v1080_v1  ;;  %v1119_v7 = vadd.f32 %v1118_v6, %v1117_v2  ;;  %v1120_v8 = vpop.f32.mrb[14].mxu1 }
 0x147   :  { %v1121_v10 = vpop.f32.mrb[15].mxu1 }
 0x148   :  { %v620_v9 = vadd.f32 %v1082_v5, %v980_v14  ;;  %v682_v11 = vadd.f32 %v1119_v7, %v617_v4  ;;  %v1122_v12 = vadd.f32 %v1121_v10, %v1120_v8 }
 0x14a   :  { %v1139_v13 = vpop.f32.mrb[16].mxu0  ;;  %v685_v15 = vadd.f32 %v1122_v12, %v620_v9 }
 0x14b   :  { %v1140_v16 = vpop.f32.mrb[17].mxu0 }
 0x14c   :  { %v1141_v17 = vadd.f32 %v1140_v16, %v1139_v13  ;;  %v1142_v18 = vpop.f32.mrb[18].mxu0  ;;  %v1184_v20 = vpop.f32.mrb[16].mxu1 }
 0x14d   :  { %v1143_v19 = vpop.f32.mrb[19].mxu0  ;;  %v787_v23 = vpop.f32.mrb[17].mxu1 }
 0x14e   :  { %v1144_v21 = vadd.f32 %v1143_v19, %v1142_v18  ;;  %v723_v22 = vadd.f32 %v1141_v17, %v658_v27  ;;  %v1185_v24 = vpop.f32.mrb[18].mxu1 }
 0x14f   :  { %v790_v28 = vpop.f32.mrb[19].mxu1 }
 0x150   :  { %v788_v25 = vadd.f32 %v787_v23, %v723_v22  ;;  %v726_v26 = vadd.f32 %v1144_v21, %v661_v30 }
 0x152   :  { %v791_v29 = vadd.f32 %v790_v28, %v726_v26  ;;  %v1145_v31 = vpop.f32.mrb[20].mxu0  ;;  %v818_v32 = vmax.f32 %v788_v25, 0.0 }
 0x153   :  { %v1146_v14 = vpop.f32.mrb[21].mxu0 }
 0x154   :  { %v819_v33 = vmax.f32 %v791_v29, 0.0  ;;  %v1147_v34 = vadd.f32 %v1146_v14, %v1145_v31  ;;  %v1148_v35 = vpop.f32.mrb[22].mxu0  ;;  %v1188_v37 = vpop.f32.mrb[20].mxu1 }
 0x155   :  { %v1149_v36 = vpop.f32.mrb[23].mxu0  ;;  %v803_v41 = vpop.f32.mrb[21].mxu1 }
 0x156   :  { %v826_v38 = vpack.c.bf16 %v819_v33, %v818_v32  ;;  %v731_v39 = vadd.f32 %v1147_v34, %v666_v43  ;;  %v1150_v40 = vadd.f32 %v1149_v36, %v1148_v35  ;;  %v1189_v42 = vpop.f32.mrb[22].mxu1 }
 0x157   :  { %v806_v45 = vpop.f32.mrb[23].mxu1 }
 0x158   :  { %v796_v27 = vadd.f32 %v1184_v20, %v731_v39  ;;  %v734_v44 = vadd.f32 %v1150_v40, %v669_v46  ;;  %1206 = vmatprep.mubr.bf16.mxu0 %v826_v38 }
 0x15a   :  { %v799_v30 = vadd.f32 %v1185_v24, %v734_v44  ;;  %v1151_v47 = vpop.f32.mrb[24].mxu0  ;;  %v820_v49 = vmax.f32 %v796_v27, 0.0 }
 0x15b   :  { %v1152_v48 = vpop.f32.mrb[25].mxu0 }
 0x15c   :  { %v821_v50 = vmax.f32 %v799_v30, 0.0  ;;  %v1153_v51 = vadd.f32 %v1152_v48, %v1151_v47  ;;  %v1154_v52 = vpop.f32.mrb[26].mxu0 }
 0x15d   :  { %v1155_v53 = vpop.f32.mrb[27].mxu0 }
 0x15e   :  { %v827_v54 = vpack.c.bf16 %v821_v50, %v820_v49  ;;  %v1156_v55 = vadd.f32 %v1155_v53, %v1154_v52  ;;  %v739_v56 = vadd.f32 %v1153_v51, %v674_v59 }
 0x160   :  { %v804_v57 = vadd.f32 %v803_v41, %v739_v56  ;;  %1207 = vmatmul.mubr.bf16.vlgmr.msra.gmra.mrb[32].mxu0 %v827_v54  ;;  %v742_v43 = vadd.f32 %v1156_v55, %v677_v62  ;;  %v1034_v62 = vld [vmem:[%s1481_s4] ss:$0 sm:$0xff] }
 0x162   :  { %v807_v58 = vadd.f32 %v806_v45, %v742_v43  ;;  %v1157_v60 = vpop.f32.mrb[28].mxu0  ;;  %v822_v46 = vmax.f32 %v804_v57, 0.0 }
 0x163   :  { %v1158_v61 = vpop.f32.mrb[29].mxu0 }
 0x164   :  { %v823_v63 = vmax.f32 %v807_v58, 0.0  ;;  %v1159_v0 = vadd.f32 %v1158_v61, %v1157_v60  ;;  %v1160_v1 = vpop.f32.mrb[30].mxu0 }
 0x165   :  { %v1161_v2 = vpop.f32.mrb[31].mxu0 }
 0x166   :  { %v828_v3 = vpack.c.bf16 %v823_v63, %v822_v46  ;;  %v747_v4 = vadd.f32 %v1159_v0, %v682_v11  ;;  %v1162_v5 = vadd.f32 %v1161_v2, %v1160_v1 }
 0x168   :  { %v812_v6 = vadd.f32 %v1188_v37, %v747_v4  ;;  %v750_v7 = vadd.f32 %v1162_v5, %v685_v15  ;;  %1210 = vmatprep.mubr.bf16.mxu1 %v828_v3 }
 0x16a   :  { %v815_v8 = vadd.f32 %v1189_v42, %v750_v7  ;;  %v824_v9 = vmax.f32 %v812_v6, 0.0 }
 0x16c   :  { %v825_v59 = vmax.f32 %v815_v8, 0.0 }
 0x16e   :  { %v829_v10 = vpack.c.bf16 %v825_v59, %v824_v9 }
 0x170   :  { %1211 = vmatmul.mubr.bf16.vlgmr.msra.gmra.mrb[24].mxu1 %v829_v10 }
 0x233   :  { %v1208_v12 = vpop.f32.mrb[32].mxu0 }
 0x234   :  { %v944_v13 = vadd.f32 %v1208_v12, %v1034_v62  ;;  %v935_v16 = vpop.f32.mrb[33].mxu0 }
 0x235   :  { %v936_v17 = vadd.f32 %v1034_v62, %v935_v16  ;;  %v1209_v18 = vpop.f32.mrb[34].mxu0 }
 0x236   :  { %968 = vst [vmem:[%s1482_s5 + $0x10] sm:$0xff] %v944_v13  ;;  %v947_v11 = vadd.f32 %v1209_v18, %v1034_v62  ;;  %v938_v15 = vpop.f32.mrb[35].mxu0 }
 0x237   :  { %966 = vst [vmem:[%s1482_s5] sm:$0xff] %v936_v17  ;;  %v939_v19 = vadd.f32 %v1034_v62, %v938_v15 }
 0x238   :  { %969 = vst [vmem:[%s1482_s5 + $0x18] sm:$0xff] %v947_v11 }
 0x239   :  { %967 = vst [vmem:[%s1482_s5 + $0x8] sm:$0xff] %v939_v19 }
 0x243   :  { %v1212_v20 = vpop.f32.mrb[24].mxu1 }
 0x244   :  { %v960_v21 = vadd.f32 %v1212_v20, %v1034_v62  ;;  %v951_v22 = vpop.f32.mrb[25].mxu1 }
 0x245   :  { %v952_v23 = vadd.f32 %v1034_v62, %v951_v22  ;;  %v1213_v24 = vpop.f32.mrb[26].mxu1 }
 0x246   :  { %972 = vst [vmem:[%s1482_s5 + $0x30] sm:$0xff] %v960_v21  ;;  %v963_v25 = vadd.f32 %v1213_v24, %v1034_v62  ;;  %v954_v26 = vpop.f32.mrb[27].mxu1 }
 0x247   :  { %970 = vst [vmem:[%s1482_s5 + $0x20] sm:$0xff] %v952_v23  ;;  %v955_v28 = vadd.f32 %v1034_v62, %v954_v26 }
 0x248   :  { %973 = vst [vmem:[%s1482_s5 + $0x38] sm:$0xff] %v963_v25 }
 0x249   :  { %971 = vst [vmem:[%s1482_s5 + $0x28] sm:$0xff] %v955_v28 }
 0x24a   :  { %978 = vsyncpa [#allocation3], 1 }
 0x24b   :  { %979 = vsyncpa [#allocation5], 1 }

</bundles_post_ra>
